<compile_context>
chip_gen: v7x
topology: tpu7x:2x2x1
jax: 0.10.0
libtpu: 0.0.40
codegen_flags: <defaults>
</compile_context>

<pallas_src>
import jax
import jax.numpy as jnp
import numpy as np
from jax.experimental import pallas as pl
from jax.experimental.pallas import tpu as pltpu


_LANE = 128            # output / tile last dim must be a multiple of the lane width
_CHUNK = 8             # f32 sublane granularity for streamed D-chunks
_MAX_TILE_LANES = 4096 # spatial tile cap; keeps double-buffered input well under
                       # the default scoped-VMEM limit on v5e / v6e / v7x


def _make_flow_regression_kernel(D: int):
    n_full = D // _CHUNK
    rem = D % _CHUNK

    def kernel(du_ref, dv_ref, cost_ref, out_ref):
        # du_ref, dv_ref: (D, 1) f32 displacement weights
        # cost_ref: (D, T) f32/bf16, out_ref: (2, T) f32, T % 128 == 0
        T = cost_ref.shape[1]
        f32 = jnp.float32

        def chunk(i):
            st = i * _CHUNK
            return cost_ref[st:st + _CHUNK, :].astype(f32)

        # ---- pass 1: running max over the displacement axis ----
        if n_full > 0:
            m8 = chunk(0)                                   # (8, T)
            for i in range(1, n_full):
                m8 = jnp.maximum(m8, chunk(i))              # VPU only
            m = jnp.max(m8, axis=0, keepdims=True)          # one XLU reduce
            if rem:
                tail = cost_ref[n_full * _CHUNK:D, :].astype(f32)
                m = jnp.maximum(m, jnp.max(tail, axis=0, keepdims=True))
        else:
            tail = cost_ref[0:D, :].astype(f32)
            m = jnp.max(tail, axis=0, keepdims=True)        # (1, T)

        # ---- pass 2: streamed softmax-weighted accumulation ----
        s = jnp.zeros((1, T), f32)
        su = jnp.zeros((1, T), f32)
        sv = jnp.zeros((1, T), f32)

        if n_full > 0:
            mb = jnp.broadcast_to(m, (_CHUNK, T))           # hoisted broadcast
            s8 = jnp.zeros((_CHUNK, T), f32)
            su8 = jnp.zeros((_CHUNK, T), f32)
            sv8 = jnp.zeros((_CHUNK, T), f32)
            for i in range(n_full):
                st = i * _CHUNK
                p = jnp.exp(chunk(i) - mb)                  # (8, T), EUP
                wu = du_ref[st:st + _CHUNK, :]              # (8, 1)
                wv = dv_ref[st:st + _CHUNK, :]              # (8, 1)
                s8 = s8 + p
                su8 = su8 + p * wu
                sv8 = sv8 + p * wv
            s = s + jnp.sum(s8, axis=0, keepdims=True)      # single final reduces
            su = su + jnp.sum(su8, axis=0, keepdims=True)
            sv = sv + jnp.sum(sv8, axis=0, keepdims=True)

        if rem:
            st = n_full * _CHUNK
            p = jnp.exp(cost_ref[st:D, :].astype(f32) - m)  # (rem, T)
            wu = du_ref[st:D, :]
            wv = dv_ref[st:D, :]
            s = s + jnp.sum(p, axis=0, keepdims=True)
            su = su + jnp.sum(p * wu, axis=0, keepdims=True)
            sv = sv + jnp.sum(p * wv, axis=0, keepdims=True)

        inv_s = pl.reciprocal(s, approx=False)              # (1, T)
        out_ref[0:1, :] = (su * inv_s).astype(out_ref.dtype)
        out_ref[1:2, :] = (sv * inv_s).astype(out_ref.dtype)

    return kernel


def flow_regression(cost: jax.Array) -> jax.Array:
    """Pallas equivalent of FlowRegression.forward.

    cost: (batch, du, dv, h, w), f32 or bf16
    returns: (batch, 2, h, w) float32
    """
    batch, du, dv, h, w = cost.shape
    # The PyTorch module's arange(-r, r+1) construction implies odd du, dv.
    assert du % 2 == 1 and dv % 2 == 1, "FlowRegression requires odd du, dv"
    D = du * dv
    HW = h * w
    ru, rv = (du - 1) // 2, (dv - 1) // 2

    # Displacement weights for the flattened axis d = u*dv + v:
    #   disp_u[d] = u - ru, disp_v[d] = v - rv. Passed as kernel inputs.
    disp_u = jnp.asarray(
        np.repeat(np.arange(-ru, ru + 1, dtype=np.float32), dv).reshape(D, 1))
    disp_v = jnp.asarray(
        np.tile(np.arange(-rv, rv + 1, dtype=np.float32), du).reshape(D, 1))

    # Lane-dense layout: (B, D, H*W). Keep input dtype (bf16 inputs halve HBM
    # reads; the kernel casts each chunk to f32).
    cost_flat = cost.reshape(batch, D, HW)

    # Spatial tile: multiple of 128 lanes, capped; pad H*W so it divides evenly.
    hw_r = -(-HW // _LANE) * _LANE
    tile = min(_MAX_TILE_LANES, hw_r)
    padded = -(-HW // tile) * tile
    if padded != HW:
        cost_flat = jnp.pad(cost_flat, ((0, 0), (0, 0), (0, padded - HW)))
    n_tiles = padded // tile

    kernel = _make_flow_regression_kernel(D)

    out = pl.pallas_call(
        kernel,
        out_shape=jax.ShapeDtypeStruct((batch, 2, padded), jnp.float32),
        grid_spec=pltpu.PrefetchScalarGridSpec(
            num_scalar_prefetch=0,
            grid=(batch, n_tiles),
            in_specs=[
                pl.BlockSpec((D, 1), lambda b, t: (0, 0)),        # disp_u (tiny)
                pl.BlockSpec((D, 1), lambda b, t: (0, 0)),        # disp_v (tiny)
                pl.BlockSpec((None, D, tile), lambda b, t: (b, 0, t)),
            ],
            out_specs=pl.BlockSpec((None, 2, tile), lambda b, t: (b, 0, t)),
        ),
        compiler_params=pltpu.CompilerParams(
            dimension_semantics=("parallel", "parallel"),
        ),
    )(disp_u, disp_v, cost_flat)

    return out[:, :, :HW].reshape(batch, 2, h, w)


def flow_regression_ref(cost: jax.Array) -> jax.Array:
    """Pure-JAX reference mirroring the PyTorch module."""
    batch, du, dv, h, w = cost.shape
    ru, rv = (du - 1) // 2, (dv - 1) // 2
    disp_u = jnp.arange(-ru, ru + 1, dtype=jnp.float32).reshape(du, 1)
    disp_u = jnp.broadcast_to(disp_u, (du, dv))
    disp_v = jnp.arange(-rv, rv + 1, dtype=jnp.float32).reshape(1, dv)
    disp_v = jnp.broadcast_to(disp_v, (du, dv))
    disp = jnp.stack((disp_u, disp_v), axis=0).reshape(1, 2, du, dv, 1, 1)

    cost_flat = cost.reshape(batch, du * dv, h, w)
    prob = jax.nn.softmax(cost_flat.astype(jnp.float32), axis=1)
    prob = prob.reshape(batch, 1, du, dv, h, w)
    flow = jnp.sum(prob * disp, axis=(2, 3))
    return flow


if __name__ == "__main__":
    key = jax.random.PRNGKey(0)
    batch, du, dv, h, w = 2, 9, 9, 16, 16
    cost = jax.random.normal(key, (batch, du, dv, h, w), dtype=jnp.float32)

    flow = flow_regression(cost)
    jax.block_until_ready(flow)

    flow_ref = flow_regression_ref(cost)
    assert flow.shape == (batch, 2, h, w)
    assert jnp.allclose(flow, flow_ref, atol=1e-5, rtol=1e-5), (
        "mismatch vs reference"
    )
    print("KERNEL_OK")
</pallas_src>

<mosaic_0001>
module attributes {stable_mosaic.version = 11 : i64} {
  func.func @kernel(%arg0: i32, %arg1: i32, %arg2: memref<81x1xf32, #tpu.memory_space<vmem>>, %arg3: memref<81x1xf32, #tpu.memory_space<vmem>>, %arg4: memref<1x81x256xf32, #tpu.memory_space<vmem>>, %arg5: memref<1x2x256xf32, #tpu.memory_space<vmem>>) attributes {dimension_semantics = [#tpu.dimension_semantics<parallel>, #tpu.dimension_semantics<parallel>], iteration_bounds = array<i64: 2, 1>, scalar_prefetch = 0 : i64, scratch_operands = 0 : i64, tpu.core_type = #tpu.core_type<tc>, window_params = [{pipeline_mode = #tpu.pipeline_mode<synchronous>, transform_indices = @transform_0, window_bounds = array<i64: 81, 1>}, {pipeline_mode = #tpu.pipeline_mode<synchronous>, transform_indices = @transform_1, window_bounds = array<i64: 81, 1>}, {transform_indices = @transform_2, window_bounds = array<i64: 1, 81, 256>}, {transform_indices = @transform_3, window_bounds = array<i64: 1, 2, 256>}]} {
    %c0 = arith.constant 0 : index
    %c0_0 = arith.constant 0 : index
    %c0_1 = arith.constant 0 : index
    %0 = vector.load %arg4[%c0, %c0_0, %c0_1] : memref<1x81x256xf32, #tpu.memory_space<vmem>>, vector<1x8x256xf32>
    %1 = vector.shape_cast %0 : vector<1x8x256xf32> to vector<8x256xf32>
    %c0_2 = arith.constant 0 : index
    %c8 = arith.constant 8 : index
    %c0_3 = arith.constant 0 : index
    %2 = vector.load %arg4[%c0_2, %c8, %c0_3] : memref<1x81x256xf32, #tpu.memory_space<vmem>>, vector<1x8x256xf32>
    %3 = vector.shape_cast %2 : vector<1x8x256xf32> to vector<8x256xf32>
    %4 = arith.maximumf %1, %3 : vector<8x256xf32>
    %c0_4 = arith.constant 0 : index
    %c16 = arith.constant 16 : index
    %c0_5 = arith.constant 0 : index
    %5 = vector.load %arg4[%c0_4, %c16, %c0_5] : memref<1x81x256xf32, #tpu.memory_space<vmem>>, vector<1x8x256xf32>
    %6 = vector.shape_cast %5 : vector<1x8x256xf32> to vector<8x256xf32>
    %7 = arith.maximumf %4, %6 : vector<8x256xf32>
    %c0_6 = arith.constant 0 : index
    %c24 = arith.constant 24 : index
    %c0_7 = arith.constant 0 : index
    %8 = vector.load %arg4[%c0_6, %c24, %c0_7] : memref<1x81x256xf32, #tpu.memory_space<vmem>>, vector<1x8x256xf32>
    %9 = vector.shape_cast %8 : vector<1x8x256xf32> to vector<8x256xf32>
    %10 = arith.maximumf %7, %9 : vector<8x256xf32>
    %c0_8 = arith.constant 0 : index
    %c32 = arith.constant 32 : index
    %c0_9 = arith.constant 0 : index
    %11 = vector.load %arg4[%c0_8, %c32, %c0_9] : memref<1x81x256xf32, #tpu.memory_space<vmem>>, vector<1x8x256xf32>
    %12 = vector.shape_cast %11 : vector<1x8x256xf32> to vector<8x256xf32>
    %13 = arith.maximumf %10, %12 : vector<8x256xf32>
    %c0_10 = arith.constant 0 : index
    %c40 = arith.constant 40 : index
    %c0_11 = arith.constant 0 : index
    %14 = vector.load %arg4[%c0_10, %c40, %c0_11] : memref<1x81x256xf32, #tpu.memory_space<vmem>>, vector<1x8x256xf32>
    %15 = vector.shape_cast %14 : vector<1x8x256xf32> to vector<8x256xf32>
    %16 = arith.maximumf %13, %15 : vector<8x256xf32>
    %c0_12 = arith.constant 0 : index
    %c48 = arith.constant 48 : index
    %c0_13 = arith.constant 0 : index
    %17 = vector.load %arg4[%c0_12, %c48, %c0_13] : memref<1x81x256xf32, #tpu.memory_space<vmem>>, vector<1x8x256xf32>
    %18 = vector.shape_cast %17 : vector<1x8x256xf32> to vector<8x256xf32>
    %19 = arith.maximumf %16, %18 : vector<8x256xf32>
    %c0_14 = arith.constant 0 : index
    %c56 = arith.constant 56 : index
    %c0_15 = arith.constant 0 : index
    %20 = vector.load %arg4[%c0_14, %c56, %c0_15] : memref<1x81x256xf32, #tpu.memory_space<vmem>>, vector<1x8x256xf32>
    %21 = vector.shape_cast %20 : vector<1x8x256xf32> to vector<8x256xf32>
    %22 = arith.maximumf %19, %21 : vector<8x256xf32>
    %c0_16 = arith.constant 0 : index
    %c64 = arith.constant 64 : index
    %c0_17 = arith.constant 0 : index
    %23 = vector.load %arg4[%c0_16, %c64, %c0_17] : memref<1x81x256xf32, #tpu.memory_space<vmem>>, vector<1x8x256xf32>
    %24 = vector.shape_cast %23 : vector<1x8x256xf32> to vector<8x256xf32>
    %25 = arith.maximumf %22, %24 : vector<8x256xf32>
    %c0_18 = arith.constant 0 : index
    %c72 = arith.constant 72 : index
    %c0_19 = arith.constant 0 : index
    %26 = vector.load %arg4[%c0_18, %c72, %c0_19] : memref<1x81x256xf32, #tpu.memory_space<vmem>>, vector<1x8x256xf32>
    %27 = vector.shape_cast %26 : vector<1x8x256xf32> to vector<8x256xf32>
    %28 = arith.maximumf %25, %27 : vector<8x256xf32>
    %cst = arith.constant dense<0xFF800000> : vector<256xf32>
    %29 = vector.multi_reduction <maximumf>, %28, %cst [0] : vector<8x256xf32> to vector<256xf32>
    %30 = vector.shape_cast %29 : vector<256xf32> to vector<1x256xf32>
    %c0_20 = arith.constant 0 : index
    %c80 = arith.constant 80 : index
    %c0_21 = arith.constant 0 : index
    %31 = vector.load %arg4[%c0_20, %c80, %c0_21] : memref<1x81x256xf32, #tpu.memory_space<vmem>>, vector<1x1x256xf32>
    %32 = vector.shape_cast %31 : vector<1x1x256xf32> to vector<1x256xf32>
    %cst_22 = arith.constant dense<0xFF800000> : vector<256xf32>
    %33 = vector.multi_reduction <maximumf>, %32, %cst_22 [0] : vector<1x256xf32> to vector<256xf32>
    %34 = vector.shape_cast %33 : vector<256xf32> to vector<1x256xf32>
    %35 = arith.maximumf %30, %34 : vector<1x256xf32>
    %cst_23 = arith.constant 0.000000e+00 : f32
    %36 = vector.broadcast %cst_23 : f32 to vector<1x256xf32>
    %cst_24 = arith.constant 0.000000e+00 : f32
    %37 = vector.broadcast %cst_24 : f32 to vector<1x256xf32>
    %cst_25 = arith.constant 0.000000e+00 : f32
    %38 = vector.broadcast %cst_25 : f32 to vector<1x256xf32>
    %39 = vector.shape_cast %35 : vector<1x256xf32> to vector<1x256xf32>
    %40 = vector.broadcast %39 : vector<1x256xf32> to vector<8x256xf32>
    %cst_26 = arith.constant 0.000000e+00 : f32
    %41 = vector.broadcast %cst_26 : f32 to vector<8x256xf32>
    %cst_27 = arith.constant 0.000000e+00 : f32
    %42 = vector.broadcast %cst_27 : f32 to vector<8x256xf32>
    %cst_28 = arith.constant 0.000000e+00 : f32
    %43 = vector.broadcast %cst_28 : f32 to vector<8x256xf32>
    %c0_29 = arith.constant 0 : index
    %c0_30 = arith.constant 0 : index
    %c0_31 = arith.constant 0 : index
    %44 = vector.load %arg4[%c0_29, %c0_30, %c0_31] : memref<1x81x256xf32, #tpu.memory_space<vmem>>, vector<1x8x256xf32>
    %45 = vector.shape_cast %44 : vector<1x8x256xf32> to vector<8x256xf32>
    %46 = arith.subf %45, %40 : vector<8x256xf32>
    %47 = math.exp %46 : vector<8x256xf32>
    %c0_32 = arith.constant 0 : index
    %c0_33 = arith.constant 0 : index
    %48 = vector.load %arg2[%c0_32, %c0_33] : memref<81x1xf32, #tpu.memory_space<vmem>>, vector<8x1xf32>
    %c0_34 = arith.constant 0 : index
    %c0_35 = arith.constant 0 : index
    %49 = vector.load %arg3[%c0_34, %c0_35] : memref<81x1xf32, #tpu.memory_space<vmem>>, vector<8x1xf32>
    %50 = arith.addf %41, %47 : vector<8x256xf32>
    %51 = vector.broadcast %48 : vector<8x1xf32> to vector<8x256xf32>
    %52 = arith.mulf %47, %51 : vector<8x256xf32>
    %53 = arith.addf %42, %52 : vector<8x256xf32>
    %54 = vector.broadcast %49 : vector<8x1xf32> to vector<8x256xf32>
    %55 = arith.mulf %47, %54 : vector<8x256xf32>
    %56 = arith.addf %43, %55 : vector<8x256xf32>
    %c0_36 = arith.constant 0 : index
    %c8_37 = arith.constant 8 : index
    %c0_38 = arith.constant 0 : index
    %57 = vector.load %arg4[%c0_36, %c8_37, %c0_38] : memref<1x81x256xf32, #tpu.memory_space<vmem>>, vector<1x8x256xf32>
    %58 = vector.shape_cast %57 : vector<1x8x256xf32> to vector<8x256xf32>
    %59 = arith.subf %58, %40 : vector<8x256xf32>
    %60 = math.exp %59 : vector<8x256xf32>
    %c8_39 = arith.constant 8 : index
    %c0_40 = arith.constant 0 : index
    %61 = vector.load %arg2[%c8_39, %c0_40] : memref<81x1xf32, #tpu.memory_space<vmem>>, vector<8x1xf32>
    %c8_41 = arith.constant 8 : index
    %c0_42 = arith.constant 0 : index
    %62 = vector.load %arg3[%c8_41, %c0_42] : memref<81x1xf32, #tpu.memory_space<vmem>>, vector<8x1xf32>
    %63 = arith.addf %50, %60 : vector<8x256xf32>
    %64 = vector.broadcast %61 : vector<8x1xf32> to vector<8x256xf32>
    %65 = arith.mulf %60, %64 : vector<8x256xf32>
    %66 = arith.addf %53, %65 : vector<8x256xf32>
    %67 = vector.broadcast %62 : vector<8x1xf32> to vector<8x256xf32>
    %68 = arith.mulf %60, %67 : vector<8x256xf32>
    %69 = arith.addf %56, %68 : vector<8x256xf32>
    %c0_43 = arith.constant 0 : index
    %c16_44 = arith.constant 16 : index
    %c0_45 = arith.constant 0 : index
    %70 = vector.load %arg4[%c0_43, %c16_44, %c0_45] : memref<1x81x256xf32, #tpu.memory_space<vmem>>, vector<1x8x256xf32>
    %71 = vector.shape_cast %70 : vector<1x8x256xf32> to vector<8x256xf32>
    %72 = arith.subf %71, %40 : vector<8x256xf32>
    %73 = math.exp %72 : vector<8x256xf32>
    %c16_46 = arith.constant 16 : index
    %c0_47 = arith.constant 0 : index
    %74 = vector.load %arg2[%c16_46, %c0_47] : memref<81x1xf32, #tpu.memory_space<vmem>>, vector<8x1xf32>
    %c16_48 = arith.constant 16 : index
    %c0_49 = arith.constant 0 : index
    %75 = vector.load %arg3[%c16_48, %c0_49] : memref<81x1xf32, #tpu.memory_space<vmem>>, vector<8x1xf32>
    %76 = arith.addf %63, %73 : vector<8x256xf32>
    %77 = vector.broadcast %74 : vector<8x1xf32> to vector<8x256xf32>
    %78 = arith.mulf %73, %77 : vector<8x256xf32>
    %79 = arith.addf %66, %78 : vector<8x256xf32>
    %80 = vector.broadcast %75 : vector<8x1xf32> to vector<8x256xf32>
    %81 = arith.mulf %73, %80 : vector<8x256xf32>
    %82 = arith.addf %69, %81 : vector<8x256xf32>
    %c0_50 = arith.constant 0 : index
    %c24_51 = arith.constant 24 : index
    %c0_52 = arith.constant 0 : index
    %83 = vector.load %arg4[%c0_50, %c24_51, %c0_52] : memref<1x81x256xf32, #tpu.memory_space<vmem>>, vector<1x8x256xf32>
    %84 = vector.shape_cast %83 : vector<1x8x256xf32> to vector<8x256xf32>
    %85 = arith.subf %84, %40 : vector<8x256xf32>
    %86 = math.exp %85 : vector<8x256xf32>
    %c24_53 = arith.constant 24 : index
    %c0_54 = arith.constant 0 : index
    %87 = vector.load %arg2[%c24_53, %c0_54] : memref<81x1xf32, #tpu.memory_space<vmem>>, vector<8x1xf32>
    %c24_55 = arith.constant 24 : index
    %c0_56 = arith.constant 0 : index
    %88 = vector.load %arg3[%c24_55, %c0_56] : memref<81x1xf32, #tpu.memory_space<vmem>>, vector<8x1xf32>
    %89 = arith.addf %76, %86 : vector<8x256xf32>
    %90 = vector.broadcast %87 : vector<8x1xf32> to vector<8x256xf32>
    %91 = arith.mulf %86, %90 : vector<8x256xf32>
    %92 = arith.addf %79, %91 : vector<8x256xf32>
    %93 = vector.broadcast %88 : vector<8x1xf32> to vector<8x256xf32>
    %94 = arith.mulf %86, %93 : vector<8x256xf32>
    %95 = arith.addf %82, %94 : vector<8x256xf32>
    %c0_57 = arith.constant 0 : index
    %c32_58 = arith.constant 32 : index
    %c0_59 = arith.constant 0 : index
    %96 = vector.load %arg4[%c0_57, %c32_58, %c0_59] : memref<1x81x256xf32, #tpu.memory_space<vmem>>, vector<1x8x256xf32>
    %97 = vector.shape_cast %96 : vector<1x8x256xf32> to vector<8x256xf32>
    %98 = arith.subf %97, %40 : vector<8x256xf32>
    %99 = math.exp %98 : vector<8x256xf32>
    %c32_60 = arith.constant 32 : index
    %c0_61 = arith.constant 0 : index
    %100 = vector.load %arg2[%c32_60, %c0_61] : memref<81x1xf32, #tpu.memory_space<vmem>>, vector<8x1xf32>
    %c32_62 = arith.constant 32 : index
    %c0_63 = arith.constant 0 : index
    %101 = vector.load %arg3[%c32_62, %c0_63] : memref<81x1xf32, #tpu.memory_space<vmem>>, vector<8x1xf32>
    %102 = arith.addf %89, %99 : vector<8x256xf32>
    %103 = vector.broadcast %100 : vector<8x1xf32> to vector<8x256xf32>
    %104 = arith.mulf %99, %103 : vector<8x256xf32>
    %105 = arith.addf %92, %104 : vector<8x256xf32>
    %106 = vector.broadcast %101 : vector<8x1xf32> to vector<8x256xf32>
    %107 = arith.mulf %99, %106 : vector<8x256xf32>
    %108 = arith.addf %95, %107 : vector<8x256xf32>
    %c0_64 = arith.constant 0 : index
    %c40_65 = arith.constant 40 : index
    %c0_66 = arith.constant 0 : index
    %109 = vector.load %arg4[%c0_64, %c40_65, %c0_66] : memref<1x81x256xf32, #tpu.memory_space<vmem>>, vector<1x8x256xf32>
    %110 = vector.shape_cast %109 : vector<1x8x256xf32> to vector<8x256xf32>
    %111 = arith.subf %110, %40 : vector<8x256xf32>
    %112 = math.exp %111 : vector<8x256xf32>
    %c40_67 = arith.constant 40 : index
    %c0_68 = arith.constant 0 : index
    %113 = vector.load %arg2[%c40_67, %c0_68] : memref<81x1xf32, #tpu.memory_space<vmem>>, vector<8x1xf32>
    %c40_69 = arith.constant 40 : index
    %c0_70 = arith.constant 0 : index
    %114 = vector.load %arg3[%c40_69, %c0_70] : memref<81x1xf32, #tpu.memory_space<vmem>>, vector<8x1xf32>
    %115 = arith.addf %102, %112 : vector<8x256xf32>
    %116 = vector.broadcast %113 : vector<8x1xf32> to vector<8x256xf32>
    %117 = arith.mulf %112, %116 : vector<8x256xf32>
    %118 = arith.addf %105, %117 : vector<8x256xf32>
    %119 = vector.broadcast %114 : vector<8x1xf32> to vector<8x256xf32>
    %120 = arith.mulf %112, %119 : vector<8x256xf32>
    %121 = arith.addf %108, %120 : vector<8x256xf32>
    %c0_71 = arith.constant 0 : index
    %c48_72 = arith.constant 48 : index
    %c0_73 = arith.constant 0 : index
    %122 = vector.load %arg4[%c0_71, %c48_72, %c0_73] : memref<1x81x256xf32, #tpu.memory_space<vmem>>, vector<1x8x256xf32>
    %123 = vector.shape_cast %122 : vector<1x8x256xf32> to vector<8x256xf32>
    %124 = arith.subf %123, %40 : vector<8x256xf32>
    %125 = math.exp %124 : vector<8x256xf32>
    %c48_74 = arith.constant 48 : index
    %c0_75 = arith.constant 0 : index
    %126 = vector.load %arg2[%c48_74, %c0_75] : memref<81x1xf32, #tpu.memory_space<vmem>>, vector<8x1xf32>
    %c48_76 = arith.constant 48 : index
    %c0_77 = arith.constant 0 : index
    %127 = vector.load %arg3[%c48_76, %c0_77] : memref<81x1xf32, #tpu.memory_space<vmem>>, vector<8x1xf32>
    %128 = arith.addf %115, %125 : vector<8x256xf32>
    %129 = vector.broadcast %126 : vector<8x1xf32> to vector<8x256xf32>
    %130 = arith.mulf %125, %129 : vector<8x256xf32>
    %131 = arith.addf %118, %130 : vector<8x256xf32>
    %132 = vector.broadcast %127 : vector<8x1xf32> to vector<8x256xf32>
    %133 = arith.mulf %125, %132 : vector<8x256xf32>
    %134 = arith.addf %121, %133 : vector<8x256xf32>
    %c0_78 = arith.constant 0 : index
    %c56_79 = arith.constant 56 : index
    %c0_80 = arith.constant 0 : index
    %135 = vector.load %arg4[%c0_78, %c56_79, %c0_80] : memref<1x81x256xf32, #tpu.memory_space<vmem>>, vector<1x8x256xf32>
    %136 = vector.shape_cast %135 : vector<1x8x256xf32> to vector<8x256xf32>
    %137 = arith.subf %136, %40 : vector<8x256xf32>
    %138 = math.exp %137 : vector<8x256xf32>
    %c56_81 = arith.constant 56 : index
    %c0_82 = arith.constant 0 : index
    %139 = vector.load %arg2[%c56_81, %c0_82] : memref<81x1xf32, #tpu.memory_space<vmem>>, vector<8x1xf32>
    %c56_83 = arith.constant 56 : index
    %c0_84 = arith.constant 0 : index
    %140 = vector.load %arg3[%c56_83, %c0_84] : memref<81x1xf32, #tpu.memory_space<vmem>>, vector<8x1xf32>
    %141 = arith.addf %128, %138 : vector<8x256xf32>
    %142 = vector.broadcast %139 : vector<8x1xf32> to vector<8x256xf32>
    %143 = arith.mulf %138, %142 : vector<8x256xf32>
    %144 = arith.addf %131, %143 : vector<8x256xf32>
    %145 = vector.broadcast %140 : vector<8x1xf32> to vector<8x256xf32>
    %146 = arith.mulf %138, %145 : vector<8x256xf32>
    %147 = arith.addf %134, %146 : vector<8x256xf32>
    %c0_85 = arith.constant 0 : index
    %c64_86 = arith.constant 64 : index
    %c0_87 = arith.constant 0 : index
    %148 = vector.load %arg4[%c0_85, %c64_86, %c0_87] : memref<1x81x256xf32, #tpu.memory_space<vmem>>, vector<1x8x256xf32>
    %149 = vector.shape_cast %148 : vector<1x8x256xf32> to vector<8x256xf32>
    %150 = arith.subf %149, %40 : vector<8x256xf32>
    %151 = math.exp %150 : vector<8x256xf32>
    %c64_88 = arith.constant 64 : index
    %c0_89 = arith.constant 0 : index
    %152 = vector.load %arg2[%c64_88, %c0_89] : memref<81x1xf32, #tpu.memory_space<vmem>>, vector<8x1xf32>
    %c64_90 = arith.constant 64 : index
    %c0_91 = arith.constant 0 : index
    %153 = vector.load %arg3[%c64_90, %c0_91] : memref<81x1xf32, #tpu.memory_space<vmem>>, vector<8x1xf32>
    %154 = arith.addf %141, %151 : vector<8x256xf32>
    %155 = vector.broadcast %152 : vector<8x1xf32> to vector<8x256xf32>
    %156 = arith.mulf %151, %155 : vector<8x256xf32>
    %157 = arith.addf %144, %156 : vector<8x256xf32>
    %158 = vector.broadcast %153 : vector<8x1xf32> to vector<8x256xf32>
    %159 = arith.mulf %151, %158 : vector<8x256xf32>
    %160 = arith.addf %147, %159 : vector<8x256xf32>
    %c0_92 = arith.constant 0 : index
    %c72_93 = arith.constant 72 : index
    %c0_94 = arith.constant 0 : index
    %161 = vector.load %arg4[%c0_92, %c72_93, %c0_94] : memref<1x81x256xf32, #tpu.memory_space<vmem>>, vector<1x8x256xf32>
    %162 = vector.shape_cast %161 : vector<1x8x256xf32> to vector<8x256xf32>
    %163 = arith.subf %162, %40 : vector<8x256xf32>
    %164 = math.exp %163 : vector<8x256xf32>
    %c72_95 = arith.constant 72 : index
    %c0_96 = arith.constant 0 : index
    %165 = vector.load %arg2[%c72_95, %c0_96] : memref<81x1xf32, #tpu.memory_space<vmem>>, vector<8x1xf32>
    %c72_97 = arith.constant 72 : index
    %c0_98 = arith.constant 0 : index
    %166 = vector.load %arg3[%c72_97, %c0_98] : memref<81x1xf32, #tpu.memory_space<vmem>>, vector<8x1xf32>
    %167 = arith.addf %154, %164 : vector<8x256xf32>
    %168 = vector.broadcast %165 : vector<8x1xf32> to vector<8x256xf32>
    %169 = arith.mulf %164, %168 : vector<8x256xf32>
    %170 = arith.addf %157, %169 : vector<8x256xf32>
    %171 = vector.broadcast %166 : vector<8x1xf32> to vector<8x256xf32>
    %172 = arith.mulf %164, %171 : vector<8x256xf32>
    %173 = arith.addf %160, %172 : vector<8x256xf32>
    %cst_99 = arith.constant dense<0.000000e+00> : vector<256xf32>
    %174 = vector.multi_reduction <add>, %167, %cst_99 [0] : vector<8x256xf32> to vector<256xf32>
    %175 = vector.shape_cast %174 : vector<256xf32> to vector<1x256xf32>
    %176 = arith.addf %36, %175 : vector<1x256xf32>
    %cst_100 = arith.constant dense<0.000000e+00> : vector<256xf32>
    %177 = vector.multi_reduction <add>, %170, %cst_100 [0] : vector<8x256xf32> to vector<256xf32>
    %178 = vector.shape_cast %177 : vector<256xf32> to vector<1x256xf32>
    %179 = arith.addf %37, %178 : vector<1x256xf32>
    %cst_101 = arith.constant dense<0.000000e+00> : vector<256xf32>
    %180 = vector.multi_reduction <add>, %173, %cst_101 [0] : vector<8x256xf32> to vector<256xf32>
    %181 = vector.shape_cast %180 : vector<256xf32> to vector<1x256xf32>
    %182 = arith.addf %38, %181 : vector<1x256xf32>
    %c0_102 = arith.constant 0 : index
    %c80_103 = arith.constant 80 : index
    %c0_104 = arith.constant 0 : index
    %183 = vector.load %arg4[%c0_102, %c80_103, %c0_104] : memref<1x81x256xf32, #tpu.memory_space<vmem>>, vector<1x1x256xf32>
    %184 = vector.shape_cast %183 : vector<1x1x256xf32> to vector<1x256xf32>
    %185 = arith.subf %184, %35 : vector<1x256xf32>
    %186 = math.exp %185 : vector<1x256xf32>
    %c80_105 = arith.constant 80 : index
    %c0_106 = arith.constant 0 : index
    %187 = vector.load %arg2[%c80_105, %c0_106] : memref<81x1xf32, #tpu.memory_space<vmem>>, vector<1x1xf32>
    %c80_107 = arith.constant 80 : index
    %c0_108 = arith.constant 0 : index
    %188 = vector.load %arg3[%c80_107, %c0_108] : memref<81x1xf32, #tpu.memory_space<vmem>>, vector<1x1xf32>
    %cst_109 = arith.constant dense<0.000000e+00> : vector<256xf32>
    %189 = vector.multi_reduction <add>, %186, %cst_109 [0] : vector<1x256xf32> to vector<256xf32>
    %190 = vector.shape_cast %189 : vector<256xf32> to vector<1x256xf32>
    %191 = arith.addf %176, %190 : vector<1x256xf32>
    %192 = vector.broadcast %187 : vector<1x1xf32> to vector<1x256xf32>
    %193 = arith.mulf %186, %192 : vector<1x256xf32>
    %cst_110 = arith.constant dense<0.000000e+00> : vector<256xf32>
    %194 = vector.multi_reduction <add>, %193, %cst_110 [0] : vector<1x256xf32> to vector<256xf32>
    %195 = vector.shape_cast %194 : vector<256xf32> to vector<1x256xf32>
    %196 = arith.addf %179, %195 : vector<1x256xf32>
    %197 = vector.broadcast %188 : vector<1x1xf32> to vector<1x256xf32>
    %198 = arith.mulf %186, %197 : vector<1x256xf32>
    %cst_111 = arith.constant dense<0.000000e+00> : vector<256xf32>
    %199 = vector.multi_reduction <add>, %198, %cst_111 [0] : vector<1x256xf32> to vector<256xf32>
    %200 = vector.shape_cast %199 : vector<256xf32> to vector<1x256xf32>
    %201 = arith.addf %182, %200 : vector<1x256xf32>
    %202 = tpu.reciprocal %191 : vector<1x256xf32> -> vector<1x256xf32>
    %203 = arith.mulf %196, %202 : vector<1x256xf32>
    %c0_112 = arith.constant 0 : index
    %c0_113 = arith.constant 0 : index
    %c0_114 = arith.constant 0 : index
    %204 = vector.load %arg5[%c0_112, %c0_113, %c0_114] : memref<1x2x256xf32, #tpu.memory_space<vmem>>, vector<1x1x256xf32>
    %205 = vector.shape_cast %204 : vector<1x1x256xf32> to vector<1x256xf32>
    %206 = vector.shape_cast %203 : vector<1x256xf32> to vector<1x1x256xf32>
    tpu.vector_store %arg5[%c0_112, %c0_113, %c0_114], %206 {strides = array<i32>} : memref<1x2x256xf32, #tpu.memory_space<vmem>>, vector<1x1x256xf32>,
    %207 = arith.mulf %201, %202 : vector<1x256xf32>
    %c0_115 = arith.constant 0 : index
    %c1 = arith.constant 1 : index
    %c0_116 = arith.constant 0 : index
    %208 = vector.load %arg5[%c0_115, %c1, %c0_116] : memref<1x2x256xf32, #tpu.memory_space<vmem>>, vector<1x1x256xf32>
    %209 = vector.shape_cast %208 : vector<1x1x256xf32> to vector<1x256xf32>
    %210 = vector.shape_cast %207 : vector<1x256xf32> to vector<1x1x256xf32>
    tpu.vector_store %arg5[%c0_115, %c1, %c0_116], %210 {strides = array<i32>} : memref<1x2x256xf32, #tpu.memory_space<vmem>>, vector<1x1x256xf32>,
    return
  }
  func.func @transform_0(%arg0: i32, %arg1: i32) -> (i32, i32) {
    %c0_i32 = arith.constant 0 : i32
    %c0_i32_0 = arith.constant 0 : i32
    %c0_i32_1 = arith.constant 0 : i32
    return %c0_i32, %c0_i32_0 : i32, i32
  }
  func.func @transform_1(%arg0: i32, %arg1: i32) -> (i32, i32) {
    %c0_i32 = arith.constant 0 : i32
    %c0_i32_0 = arith.constant 0 : i32
    %c0_i32_1 = arith.constant 0 : i32
    return %c0_i32, %c0_i32_0 : i32, i32
  }
  func.func @transform_2(%arg0: i32, %arg1: i32) -> (i32, i32, i32) {
    %c0_i32 = arith.constant 0 : i32
    %c0_i32_0 = arith.constant 0 : i32
    return %arg0, %c0_i32, %arg1 : i32, i32, i32
  }
  func.func @transform_3(%arg0: i32, %arg1: i32) -> (i32, i32, i32) {
    %c0_i32 = arith.constant 0 : i32
    %c0_i32_0 = arith.constant 0 : i32
    return %arg0, %c0_i32, %arg1 : i32, i32, i32
  }
}

</mosaic_0001>

<bundles_post_ra>
// kernel: tpu_custom_call.1
= control target key start
LH: loop header
LB: loop body
LE: loop exit
PB: predicated region body
PF: predicated region fallthrough
CT: control target
= control target key end

     0   :  { %8 = vsyncpa [#allocation3], 0  ;;  %s1505_s0 = inlined_call_operand.vmem [shape: f32[81,1], index: 0, kind: input, shape index: {}]   ;;  %s1506_s1 = inlined_call_operand.vmem [shape: f32[81,1], index: 1, kind: input, shape index: {}]   ;;  %s1507_s2 = inlined_call_operand.vmem [shape: f32[2,81,256], index: 2, kind: input, shape index: {}]   ;;  %s1508_s3 = inlined_call_operand.hbm [shape: f32[2,2,256], index: 3, kind: output, shape index: {}]  }
   0x1   :  { %10 = vsyncpa [#allocation3 + $0x1], 0  ;;  %s1046_s12 = smov 0   ;;  %s1048_s13 = smov 0  }
   0x2   :  { %s1050_s14 = smov 0   ;;  %s1052_s15 = smov 0  }
   0x3   :  { %s1054_s16 = smov 0   ;;  %s1056_s17 = smov 0  }
   0x4 LB: > { %s822_s18 = sadd.s32 4294967295, %s1021_s17   ;;  %s823_s19 = sadd.s32 4294967294, %s1021_s17   ;;  %s1021_s17 = sphi %s1056_s17, %s16_s17   ;;  %s1017_s16 = sphi %s1054_s16, %s1515_s16   ;;  %s1013_s15 = sphi %s1052_s15, %s1514_s15   ;;  %s1009_s14 = sphi %s1050_s14, %s1513_s14   ;;  %s1005_s13 = sphi %s1048_s13, %s1512_s13   ;;  %s1001_s12 = sphi %s1046_s12, %s1511_s12  }
   0x5   : > { %s28_s20 = sadd.s32 1, %s1017_s16  ;;  %s107_s21 = sadd.s32 1, %s1009_s14 }
   0x6   : > { %p30_p0 = scmp.ge.s32.totalorder %s28_s20, 2  ;;  %p117_p1 = scmp.ne.s32.totalorder %s1009_s14, %s1005_s13 }
   0x7   : > { %p118_p2 = scmp.eq.s32.totalorder %s822_s18, 1  ;;  %p123_p3 = scmp.ne.s32.totalorder %s1005_s13, %s1001_s12 }
   0x8   : > { %s1517_s20 = smov (%p30_p0, %s28_s20), 0  ;;  %p124_p5 = scmp.eq.s32.totalorder %s823_s19, 1 }
   0x9   : > { %p1086_p4 = por %p118_p2, %p117_p1  ;;  %s102_s23 = ssub.s32 %s1017_s16, %s1517_s20 }
   0xa   : > { %p826_p6 = scmp.ge.s32.totalorder %s1021_s17, 1  ;;  %p105_p7 = scmp.eq.s32.totalorder %s102_s23, 0 }
   0xb   : > { %p1093_p8 = por %p124_p5, %p123_p3  ;;  %p161_p9 = scmp.lt.s32.totalorder %s1021_s17, 3 }
   0xc   : > { %s1099_s25 = scalar_select %p105_p7, %s1009_s14, %s107_s21  }
   0xd   : > { %p162_p10 = pnand %p826_p6, %p161_p9 }
   0xe   : > { %v307_v0 = vld [vmem:[%s1505_s0 + $0x8] sm:$0xff] (!%p162_p10)  ;;  %v279_v1 = vld [vmem:[%s1505_s0] sm:$0xff] (!%p162_p10)  ;;  %p190_p11 = scmp.lt.s32.totalorder (!%p162_p10), %s1013_s15, 1  ;;  %v1023_v2 = vmov (!%p162_p10), 0   ;;  %v336_v5 = vld [vmem:[%s1506_s1 + $0x10] sm:$0xff] (!%p162_p10)  ;;  %s836_s27 = sshll.u32 (!%p162_p10), %s1013_s15, 6 }
   0xf   : > { %165 = sbr.rel (%p162_p10) target bundleno = 220 (0xdc), region = 32  ;;  %896 = vset.pattern.permute.xlu1 (!%p162_p10), %v1023_v2  ;;  %895 = vset.pattern.permute.xlu0 (!%p162_p10), %v1023_v2  ;;  %v308_v3 = vld [vmem:[%s1506_s1 + $0x8] sm:$0xff] (!%p162_p10)  ;;  %v280_v4 = vld [vmem:[%s1506_s1] sm:$0xff] (!%p162_p10)  ;;  %v335_v6 = vld [vmem:[%s1505_s0 + $0x10] sm:$0xff] (!%p162_p10)  ;;  %v253_v2 = vlaneseq (!%p162_p10)  ;;  %s1456_s5 = scalar_lea.hbm (!%p162_p10), %s1508_s3, %s836_s27 }
  0x10   : > { %313 = vperm.xlu1 (!%p162_p10), %896, %v307_v0   ;;  %285 = vperm.xlu0 (!%p162_p10), %895, %v279_v1   ;;  %v364_v11 = vld [vmem:[%s1506_s1 + $0x18] sm:$0xff] (!%p162_p10)  ;;  %v392_v17 = vld [vmem:[%s1506_s1 + $0x20] sm:$0xff] (!%p162_p10)  ;;  %v420_v23 = vld [vmem:[%s1506_s1 + $0x28] sm:$0xff] (!%p162_p10)  ;;  %s1025_s7 = smov (!%p162_p10), [#allocation2]  }
  0x11   : > { %v363_v12 = vld [vmem:[%s1505_s0 + $0x18] sm:$0xff] (!%p162_p10)  ;;  %v391_v18 = vld [vmem:[%s1505_s0 + $0x20] sm:$0xff] (!%p162_p10)  ;;  %v419_v24 = vld [vmem:[%s1505_s0 + $0x28] sm:$0xff] (!%p162_p10)  ;;  %vm704_vm0 = vcmp.lt.s32.totalorder (!%p162_p10), %v253_v2, 256 }
  0x12   : > { %v448_v29 = vld [vmem:[%s1506_s1 + $0x30] sm:$0xff] (!%p162_p10)  ;;  %v476_v35 = vld [vmem:[%s1506_s1 + $0x38] sm:$0xff] (!%p162_p10)  ;;  %v504_v41 = vld [vmem:[%s1506_s1 + $0x40] sm:$0xff] (!%p162_p10) }
  0x13   : > { %v447_v30 = vld [vmem:[%s1505_s0 + $0x30] sm:$0xff] (!%p162_p10)  ;;  %v475_v36 = vld [vmem:[%s1505_s0 + $0x38] sm:$0xff] (!%p162_p10)  ;;  %v503_v42 = vld [vmem:[%s1505_s0 + $0x40] sm:$0xff] (!%p162_p10) }
  0x14   : > { %322 = vperm.xlu1 (!%p162_p10), %896, %v308_v3   ;;  %294 = vperm.xlu0 (!%p162_p10), %895, %v280_v4   ;;  %v532_v47 = vld [vmem:[%s1506_s1 + $0x48] sm:$0xff] (!%p162_p10)  ;;  %v617_v53 = vld [vmem:[%s1506_s1 + $0x50] sm:$0x1] (!%p162_p10) }
  0x15   : > { %v531_v48 = vld [vmem:[%s1505_s0 + $0x48] sm:$0xff] (!%p162_p10)  ;;  %v616_v54 = vld [vmem:[%s1505_s0 + $0x50] sm:$0x1] (!%p162_p10) }
  0x16   : > { %s191_s30 = scalar_select %p190_p11, %s1013_s15, 1 }
  0x18   : > { %s837_s8 = smul.u32 176, %s191_s30  ;;  %350 = vperm.xlu1 %896, %v336_v5   ;;  %341 = vperm.xlu0 %895, %v335_v6   ;;  %v1255_v5 = vshrl.u32 %v253_v2, 7 }
  0x1a   : > { %s1118_s11 = scalar_lea.vmem %s1507_s2, %s837_s8  ;;  %s947_s8 = sshll.u32 %s1025_s7, 4  ;;  %s948_s8 = int_to_ptr.vmem [resolvable:$false] %s947_s8 }
  0x1b   : > { %v1127_v7 = vld [vmem:[%s1118_s11] sm:$0xff]  ;;  %v1130_v8 = vld [vmem:[%s1118_s11 + $0x10] sm:$0xff]  ;;  %v1133_v9 = vld [vmem:[%s1118_s11 + $0x8] sm:$0xff]  ;;  %s949_s9 = scalar_lea.vmem %s948_s8, 128 }
  0x1c   : > { %v1136_v10 = vld [vmem:[%s1118_s11 + $0x18] sm:$0xff]  ;;  %v204_v13 = vmax.f32 %v1127_v7, %v1130_v8  ;;  %v1149_v15 = vld [vmem:[%s1118_s11 + $0x20] sm:$0xff]  ;;  %378 = vperm.xlu1 %896, %v364_v11   ;;  %369 = vperm.xlu0 %895, %v363_v12   ;;  %v1152_v16 = vld [vmem:[%s1118_s11 + $0x28] sm:$0xff]  ;;  %v1258_v12 = vsub.s32 0, %v1255_v5 }
  0x1d   : > { %v205_v14 = vmax.f32 %v1133_v9, %v1136_v10  ;;  %v1163_v21 = vld [vmem:[%s1118_s11 + $0x30] sm:$0xff]  ;;  %v1166_v22 = vld [vmem:[%s1118_s11 + $0x38] sm:$0xff]  ;;  %v1177_v27 = vld [vmem:[%s1118_s11 + $0x40] sm:$0xff] }
  0x1e   : > { %v208_v19 = vmax.f32 %v204_v13, %v1149_v15  ;;  %v1180_v28 = vld [vmem:[%s1118_s11 + $0x48] sm:$0xff]  ;;  %v1191_v33 = vld [vmem:[%s1118_s11 + $0x50] sm:$0xff]  ;;  %v1194_v34 = vld [vmem:[%s1118_s11 + $0x58] sm:$0xff] }
  0x1f   : > { %v209_v20 = vmax.f32 %v205_v14, %v1152_v16  ;;  %v1205_v39 = vld [vmem:[%s1118_s11 + $0x60] sm:$0xff]  ;;  %v1208_v40 = vld [vmem:[%s1118_s11 + $0x68] sm:$0xff]  ;;  %v1219_v45 = vld [vmem:[%s1118_s11 + $0x70] sm:$0xff] }
  0x20   : > { %406 = vperm.xlu1 %896, %v392_v17   ;;  %397 = vperm.xlu0 %895, %v391_v18   ;;  %v212_v25 = vmax.f32 %v208_v19, %v1163_v21  ;;  %v1222_v46 = vld [vmem:[%s1118_s11 + $0x78] sm:$0xff]  ;;  %v1233_v51 = vld [vmem:[%s1118_s11 + $0x80] sm:$0xff]  ;;  %v1236_v52 = vld [vmem:[%s1118_s11 + $0x88] sm:$0xff]  ;;  %v1264_v17 = vsub.s32 1, %v1255_v5 }
  0x21   : > { %v213_v26 = vmax.f32 %v209_v20, %v1166_v22  ;;  %v1247_v57 = vld [vmem:[%s1118_s11 + $0x90] sm:$0xff]  ;;  %v1250_v58 = vld [vmem:[%s1118_s11 + $0x98] sm:$0xff]  ;;  %v1261_v14 = vld [vmem:[%s1118_s11 + $0xa0] ss:$8 sm:$0x3]  ;;  %s186_s11 = sand.u32 1, %s1005_s13  }
  0x22   : > { %v216_v31 = vmax.f32 %v212_v25, %v1177_v27  ;;  %v256_v19 = vrot.slane %v1261_v14, %v1258_v12  ;;  %s827_s26 = sshll.u32 %s186_s11, 2  ;;  %s730_s15 = scalar_lea.sflag [#allocation3], %s186_s11 }
  0x23   : > { %v217_v32 = vmax.f32 %v213_v26, %v1180_v28  ;;  %s188_s28 = scalar_lea.vmem [#allocation2], %s827_s26 }
  0x24   : > { %434 = vperm.xlu1 %896, %v420_v23   ;;  %425 = vperm.xlu0 %895, %v419_v24   ;;  %v220_v37 = vmax.f32 %v216_v31, %v1191_v33  ;;  %v260_v23 = vrot.slane %v1261_v14, %v1264_v17  ;;  %s746_s29 = sshll.u32 %s188_s28, 4  ;;  %s1458_s29 = int_to_ptr.vmem [resolvable:$true] %s746_s29 }
  0x25   : > { %v221_v38 = vmax.f32 %v217_v32, %v1194_v34  ;;  %s943_s6 = scalar_lea.vmem %s1458_s29, 64  ;;  %p950_p1 = scmp.lt.s32.totalorder %s1458_s29, %s948_s8 }
  0x26   : > { %v224_v43 = vmax.f32 %v220_v37, %v1205_v39  ;;  %p944_p12 = scmp.ne.s32.totalorder %s1458_s29, %s943_s6  ;;  %p951_p2 = scmp.lt.s32.totalorder %s949_s9, %s943_s6 }
  0x27   : > { %v225_v44 = vmax.f32 %v221_v38, %v1208_v40 }
  0x28   : > { %462 = vperm.xlu1 %896, %v448_v29   ;;  %453 = vperm.xlu0 %895, %v447_v30   ;;  %v228_v49 = vmax.f32 %v224_v43, %v1219_v45  ;;  %p945_p13 = pnand %p944_p12, %p1086_p4  ;;  %p952_p3 = por %p951_p2, %p950_p1 }
  0x29   : > { %v229_v50 = vmax.f32 %v225_v44, %v1222_v46 }
  0x2a   : > { %v232_v55 = vmax.f32 %v228_v49, %v1233_v51  ;;  %p946_p0 = pneg %p945_p13 }
  0x2b   : > { %v233_v56 = vmax.f32 %v229_v50, %v1236_v52 }
  0x2c   : > { %490 = vperm.xlu1 %896, %v476_v35   ;;  %481 = vperm.xlu0 %895, %v475_v36   ;;  %v236_v59 = vmax.f32 %v232_v55, %v1247_v57  ;;  %p953_p5 = pnand %p952_p3, %p946_p0 }
  0x2d   : > { %v237_v60 = vmax.f32 %v233_v56, %v1250_v58 }
  0x2e   : > { %v238_v61 = vrot.slane %v236_v59, 4 }
  0x2f   : > { %v244_v62 = vrot.slane %v237_v60, 4 }
  0x30   : > { %518 = vperm.xlu1 %896, %v504_v41   ;;  %509 = vperm.xlu0 %895, %v503_v42   ;;  %v239_v63 = vmax.f32 %v236_v59, %v238_v61 }
  0x31   : > { %v245_v0 = vmax.f32 %v237_v60, %v244_v62 }
  0x32   : > { %v240_v1 = vrot.slane %v239_v63, 2 }
  0x33   : > { %v246_v3 = vrot.slane %v245_v0, 2 }
  0x34   : > { %546 = vperm.xlu1 %896, %v532_v47   ;;  %537 = vperm.xlu0 %895, %v531_v48   ;;  %v241_v4 = vmax.f32 %v239_v63, %v240_v1 }
  0x35   : > { %v247_v6 = vmax.f32 %v245_v0, %v246_v3 }
  0x36   : > { %v242_v11 = vrot.slane %v241_v4, 1 }
  0x37   : > { %v248_v13 = vrot.slane %v247_v6, 1 }
  0x38   : > { %658 = vperm.xlu1 %896, %v617_v53   ;;  %634 = vperm.xlu0 %895, %v616_v54   ;;  %v243_v18 = vmax.f32 %v241_v4, %v242_v11 }
  0x39   : > { %v249_v20 = vmax.f32 %v247_v6, %v248_v13 }
  0x3a   : > { %v1270_v24 = vmax.f32 %v243_v18, %v256_v19 }
  0x3b   : > { %v1272_v25 = vmax.f32 %v249_v20, %v260_v23 }
  0x3c   : > { %v1276_v26 = vrot.slane %v1270_v24, %v1258_v12 }
  0x3d   : > { %v1280_v29 = vrot.slane %v1272_v25, %v1258_v12 }
  0x3e   : > { %v301_v30 = vsub.f32 %v1130_v8, %v1276_v26  ;;  %v273_v32 = vsub.f32 %v1127_v7, %v1276_v26  ;;  %v329_v41 = vsub.f32 %v1149_v15, %v1276_v26  ;;  %v357_v7 = vsub.f32 %v1163_v21, %v1276_v26 }
  0x3f   : > { %v302_v31 = vsub.f32 %v1136_v10, %v1280_v29  ;;  %v274_v35 = vsub.f32 %v1133_v9, %v1280_v29  ;;  %v330_v43 = vsub.f32 %v1152_v16, %v1280_v29  ;;  %v358_v9 = vsub.f32 %v1166_v22, %v1280_v29 }
  0x40   : > { %v303_v36 = vmul.f32 1.442695, %v301_v30  ;;  %v275_v38 = vmul.f32 1.442695, %v273_v32  ;;  %v331_v8 = vmul.f32 1.442695, %v329_v41  ;;  %v385_v44 = vsub.f32 %v1177_v27, %v1276_v26 }
  0x41   : > { %v305_v37 = vmul.f32 1.442695, %v302_v31  ;;  %v277_v42 = vmul.f32 1.442695, %v274_v35  ;;  %v333_v10 = vmul.f32 1.442695, %v330_v43  ;;  %v386_v15 = vsub.f32 %v1180_v28, %v1280_v29 }
  0x42   : > { %897 = vpow2.f32 %v303_v36  ;;  %v359_v16 = vmul.f32 1.442695, %v357_v7  ;;  %v361_v47 = vmul.f32 1.442695, %v358_v9  ;;  %v387_v48 = vmul.f32 1.442695, %v385_v44 }
  0x43   : > { %899 = vpow2.f32 %v305_v37  ;;  %v413_v49 = vsub.f32 %v1191_v33, %v1276_v26  ;;  %v389_v21 = vmul.f32 1.442695, %v386_v15  ;;  %v414_v50 = vsub.f32 %v1194_v34, %v1280_v29 }
  0x44   : > { %901 = vpow2.f32 %v275_v38  ;;  %v441_v54 = vsub.f32 %v1205_v39, %v1276_v26  ;;  %v442_v34 = vsub.f32 %v1208_v40, %v1280_v29  ;;  %v469_v39 = vsub.f32 %v1219_v45, %v1276_v26 }
  0x45   : > { %903 = vpow2.f32 %v277_v42  ;;  %v415_v28 = vmul.f32 1.442695, %v413_v49  ;;  %v417_v33 = vmul.f32 1.442695, %v414_v50  ;;  %v470_v40 = vsub.f32 %v1222_v46, %v1280_v29 }
  0x46   : > { %905 = vpow2.f32 %v331_v8  ;;  %v443_v61 = vmul.f32 1.442695, %v441_v54  ;;  %v445_v63 = vmul.f32 1.442695, %v442_v34  ;;  %v471_v4 = vmul.f32 1.442695, %v469_v39 }
  0x47   : > { %907 = vpow2.f32 %v333_v10  ;;  %v497_v6 = vsub.f32 %v1233_v51, %v1276_v26  ;;  %v473_v45 = vmul.f32 1.442695, %v470_v40  ;;  %v498_v13 = vsub.f32 %v1236_v52, %v1280_v29 }
  0x48   : > { %909 = vpow2.f32 %v359_v16  ;;  %v525_v51 = vsub.f32 %v1247_v57, %v1276_v26  ;;  %v526_v31 = vsub.f32 %v1250_v58, %v1280_v29  ;;  %v1024_v57 = vmov 1966171168  }
  0x49   : > { %911 = vpow2.f32 %v361_v47  ;;  %v499_v23 = vmul.f32 1.442695, %v497_v6  ;;  %v501_v30 = vmul.f32 1.442695, %v498_v13  ;;  %v599_v26 = vunpack.c.l.s4 %v1024_v57 }
  0x4a   : > { %913 = vpow2.f32 %v387_v48  ;;  %v527_v37 = vmul.f32 1.442695, %v525_v51  ;;  %v529_v38 = vmul.f32 1.442695, %v526_v31  ;;  %v597_v47 = vcombine.low %v1270_v24, %v1272_v25 }
  0x4b   : > { %915 = vpow2.f32 %v389_v21  ;;  %v600_v8 = vunpack.c.0.s8 %v599_v26 }
  0x4c   : > { %v1306_v53 = vpop.eup %897  ;;  %917 = vpow2.f32 %v415_v28 }
  0x4d   : > { %v1308_v22 = vpop.eup %899  ;;  %919 = vpow2.f32 %v417_v33  ;;  %v1375_v48 = vsub.s32 %v600_v8, %v1255_v5 }
  0x4e   : > { %v1310_v27 = vpop.eup %901  ;;  %921 = vpow2.f32 %v443_v61 }
  0x4f   : > { %v1314_v55 = vpop.eup %903  ;;  %v309_v56 = vadd.f32 %v1310_v27, %v1306_v53  ;;  %923 = vpow2.f32 %v445_v63  ;;  %v604_v34 = vrot.slane %v597_v47, %v1375_v48 }
  0x50   : > { %v310_v59 = vadd.f32 %v1314_v55, %v1308_v22  ;;  %v1322_v60 = vpop.eup %905  ;;  %925 = vpow2.f32 %v471_v4 }
  0x51   : > { %v1326_v62 = vpop.eup %907  ;;  %v337_v0 = vadd.f32 %v1322_v60, %v309_v56  ;;  %927 = vpow2.f32 %v473_v45  ;;  %v611_v25 = vrot.slane %v604_v34, %v1375_v48 }
  0x52   : > { %v338_v1 = vadd.f32 %v1326_v62, %v310_v59  ;;  %v1332_v3 = vpop.eup %909  ;;  %929 = vpow2.f32 %v499_v23 }
  0x53   : > { %v1336_v11 = vpop.eup %911  ;;  %v365_v46 = vadd.f32 %v1332_v3, %v337_v0  ;;  %931 = vpow2.f32 %v501_v30 }
  0x54   : > { %v1340_v18 = vpop.eup %913  ;;  %v366_v19 = vadd.f32 %v1336_v11, %v338_v1  ;;  %933 = vpow2.f32 %v527_v37  ;;  %v613_v1 = vsub.f32 %v1261_v14, %v611_v25 }
  0x55   : > { %v1344_v20 = vpop.eup %915  ;;  %v393_v52 = vadd.f32 %v1340_v18, %v365_v46  ;;  %935 = vpow2.f32 %v529_v38 }
  0x56   : > { %v1350_v32 = vpop.eup %917  ;;  %v394_v35 = vadd.f32 %v1344_v20, %v366_v19  ;;  %v614_v46 = vmul.f32 1.442695, %v613_v1 }
  0x57   : > { %v1354_v36 = vpop.eup %919  ;;  %v421_v42 = vadd.f32 %v1350_v32, %v393_v52 }
  0x58   : > { %v1356_v41 = vpop.eup %921  ;;  %v422_v58 = vadd.f32 %v1354_v36, %v394_v35  ;;  %937 = vpow2.f32 %v614_v46 }
  0x59   : > { %v1360_v29 = vpop.eup %923  ;;  %v449_v7 = vadd.f32 %v1356_v41, %v421_v42 }
  0x5a   : > { %v1362_v43 = vpop.eup %925  ;;  %v450_v10 = vadd.f32 %v1360_v29, %v422_v58 }
  0x5b   : > { %v1366_v9 = vpop.eup %927  ;;  %v477_v15 = vadd.f32 %v1362_v43, %v449_v7 }
  0x5c   : > { %v1368_v44 = vpop.eup %929  ;;  %v478_v16 = vadd.f32 %v1366_v9, %v450_v10 }
  0x5d   : > { %v1377_v49 = vpop.eup %931  ;;  %v505_v54 = vadd.f32 %v1368_v44, %v477_v15 }
  0x5e   : > { %v1379_v28 = vpop.eup %933  ;;  %v506_v33 = vadd.f32 %v1377_v49, %v478_v16 }
  0x5f   : > { %v1384_v56 = vpop.eup %935  ;;  %v533_v24 = vadd.f32 %v1379_v28, %v505_v54 }
  0x60   : > { %v534_v5 = vadd.f32 %v1384_v56, %v506_v33 }
  0x61   : > { %v553_v40 = vrot.slane %v533_v24, 4 }
  0x62   : > { %v559_v0 = vrot.slane %v534_v5, 4 }
  0x63   : > { %v554_v45 = vadd.f32 %v553_v40, %v533_v24 }
  0x64   : > { %v560_v13 = vadd.f32 %v559_v0, %v534_v5 }
  0x65   : > { %v555_v57 = vrot.slane %v554_v45, 2 }
  0x66   : > { %v561_v26 = vrot.slane %v560_v13, 2 }
  0x67   : > { %v556_v54 = vadd.f32 %v555_v57, %v554_v45 }
  0x68   : > { %v562_v33 = vadd.f32 %v561_v26, %v560_v13 }
  0x69   : > { %v557_v13 = vrot.slane %v556_v54, 1 }
  0x6a   : > { %v563_v46 = vrot.slane %v562_v33, 1 }
  0x8f   : > { %v314_v21 = vpop.permute.xlu1 %313  ;;  %v286_v50 = vpop.permute.xlu0 %285 }
  0x90   : > { %v316_v19 = vmul.f32 %v1306_v53, %v314_v21  ;;  %v317_v23 = vmul.f32 %v1308_v22, %v314_v21  ;;  %v288_v51 = vmul.f32 %v1310_v27, %v286_v50  ;;  %v289_v30 = vmul.f32 %v1314_v55, %v286_v50 }
  0x92   : > { %v319_v10 = vadd.f32 %v317_v23, %v289_v30 }
  0x93   : > { %v323_v59 = vpop.permute.xlu1 %322  ;;  %v295_v61 = vpop.permute.xlu0 %294 }
  0x94   : > { %v325_v31 = vmul.f32 %v1306_v53, %v323_v59  ;;  %v326_v52 = vmul.f32 %v1308_v22, %v323_v59  ;;  %v297_v35 = vmul.f32 %v1310_v27, %v295_v61  ;;  %v298_v14 = vmul.f32 %v1314_v55, %v295_v61 }
  0x95   : > { %v318_v53 = vadd.f32 %v316_v19, %v288_v51  ;;  %v1414_v19 = vpop.eup %937 }
  0x96   : > { %v327_v22 = vadd.f32 %v325_v31, %v297_v35  ;;  %v328_v15 = vadd.f32 %v326_v52, %v298_v14 }
  0x97   : > { %v351_v39 = vpop.permute.xlu1 %350  ;;  %v342_v63 = vpop.permute.xlu0 %341 }
  0x98   : > { %v353_v42 = vmul.f32 %v1322_v60, %v351_v39  ;;  %v354_v58 = vmul.f32 %v1326_v62, %v351_v39  ;;  %v344_v8 = vmul.f32 %v1322_v60, %v342_v63  ;;  %v345_v7 = vmul.f32 %v1326_v62, %v342_v63 }
  0x9a   : > { %v355_v34 = vadd.f32 %v353_v42, %v327_v22  ;;  %v356_v60 = vadd.f32 %v354_v58, %v328_v15  ;;  %v346_v59 = vadd.f32 %v344_v8, %v318_v53  ;;  %v347_v62 = vadd.f32 %v345_v7, %v319_v10 }
  0x9b   : > { %v379_v4 = vpop.permute.xlu1 %378  ;;  %v370_v6 = vpop.permute.xlu0 %369  ;;  %v558_v7 = vadd.f32 %v557_v13, %v556_v54  ;;  %v564_v53 = vadd.f32 %v563_v46, %v562_v33 }
  0x9c   : > { %v381_v27 = vmul.f32 %v1332_v3, %v379_v4  ;;  %v382_v55 = vmul.f32 %v1336_v11, %v379_v4  ;;  %v372_v16 = vmul.f32 %v1332_v3, %v370_v6  ;;  %v373_v47 = vmul.f32 %v1336_v11, %v370_v6 }
  0x9e   : > { %v383_v39 = vadd.f32 %v381_v27, %v355_v34  ;;  %v384_v3 = vadd.f32 %v382_v55, %v356_v60  ;;  %v374_v63 = vadd.f32 %v372_v16, %v346_v59  ;;  %v375_v11 = vadd.f32 %v373_v47, %v347_v62 }
  0x9f   : > { %v407_v37 = vpop.permute.xlu1 %406  ;;  %v398_v38 = vpop.permute.xlu0 %397 }
  0xa0   : > { %v409_v61 = vmul.f32 %v1340_v18, %v407_v37  ;;  %v410_v24 = vmul.f32 %v1344_v20, %v407_v37  ;;  %v400_v5 = vmul.f32 %v1340_v18, %v398_v38  ;;  %v401_v25 = vmul.f32 %v1344_v20, %v398_v38 }
  0xa2   : > { %v411_v18 = vadd.f32 %v409_v61, %v383_v39  ;;  %v412_v20 = vadd.f32 %v410_v24, %v384_v3  ;;  %v402_v23 = vadd.f32 %v400_v5, %v374_v63  ;;  %v403_v51 = vadd.f32 %v401_v25, %v375_v11 }
  0xa3   : > { %v435_v21 = vpop.permute.xlu1 %434  ;;  %v426_v50 = vpop.permute.xlu0 %425 }
  0xa4   : > { %v437_v1 = vmul.f32 %v1350_v32, %v435_v21  ;;  %v438_v4 = vmul.f32 %v1354_v36, %v435_v21  ;;  %v428_v6 = vmul.f32 %v1350_v32, %v426_v50  ;;  %v429_v45 = vmul.f32 %v1354_v36, %v426_v50 }
  0xa6   : > { %v439_v37 = vadd.f32 %v437_v1, %v411_v18  ;;  %v440_v36 = vadd.f32 %v438_v4, %v412_v20  ;;  %v430_v38 = vadd.f32 %v428_v6, %v402_v23  ;;  %v431_v57 = vadd.f32 %v429_v45, %v403_v51 }
  0xa7   : > { %v463_v40 = vpop.permute.xlu1 %462  ;;  %v454_v0 = vpop.permute.xlu0 %453 }
  0xa8   : > { %v465_v30 = vmul.f32 %v1356_v41, %v463_v40  ;;  %v466_v31 = vmul.f32 %v1360_v29, %v463_v40  ;;  %v456_v52 = vmul.f32 %v1356_v41, %v454_v0  ;;  %v457_v35 = vmul.f32 %v1360_v29, %v454_v0 }
  0xa9   : > { %v623_v41 = vrot.slane %v1414_v19, %v1258_v12  ;;  %v627_v29 = vrot.slane %v1414_v19, %v1264_v17 }
  0xaa   : > { %v467_v10 = vadd.f32 %v465_v30, %v439_v37  ;;  %v468_v22 = vadd.f32 %v466_v31, %v440_v36  ;;  %v458_v15 = vadd.f32 %v456_v52, %v430_v38  ;;  %v459_v27 = vadd.f32 %v457_v35, %v431_v57 }
  0xab   : > { %v491_v14 = vpop.permute.xlu1 %490  ;;  %v482_v32 = vpop.permute.xlu0 %481  ;;  %v630_v60 = vadd.f32 %v623_v41, %v558_v7 }
  0xac   : > { %v493_v26 = vmul.f32 %v1362_v43, %v491_v14  ;;  %v494_v42 = vmul.f32 %v1366_v9, %v491_v14  ;;  %v484_v58 = vmul.f32 %v1362_v43, %v482_v32  ;;  %v485_v8 = vmul.f32 %v1366_v9, %v482_v32 }
  0xad   : > { %939 = vrcp.f32 %v630_v60 }
  0xae   : > { %v495_v50 = vadd.f32 %v493_v26, %v467_v10  ;;  %v496_v54 = vadd.f32 %v494_v42, %v468_v22  ;;  %v486_v33 = vadd.f32 %v484_v58, %v458_v15  ;;  %v487_v34 = vadd.f32 %v485_v8, %v459_v27 }
  0xaf   : > { %v519_v55 = vpop.permute.xlu1 %518  ;;  %v510_v16 = vpop.permute.xlu0 %509 }
  0xb0   : > { %v521_v47 = vmul.f32 %v1368_v44, %v519_v55  ;;  %v522_v43 = vmul.f32 %v1377_v49, %v519_v55  ;;  %v512_v9 = vmul.f32 %v1368_v44, %v510_v16  ;;  %v513_v21 = vmul.f32 %v1377_v49, %v510_v16 }
  0xb1   : > { %v631_v49 = vadd.f32 %v627_v29, %v564_v53 }
  0xb2   : > { %v523_v59 = vadd.f32 %v521_v47, %v495_v50  ;;  %v524_v62 = vadd.f32 %v522_v43, %v496_v54  ;;  %v514_v61 = vadd.f32 %v512_v9, %v486_v33  ;;  %v515_v24 = vadd.f32 %v513_v21, %v487_v34 }
  0xb3   : > { %v547_v5 = vpop.permute.xlu1 %546  ;;  %v538_v25 = vpop.permute.xlu0 %537  ;;  %941 = vrcp.f32 %v631_v49 }
  0xb4   : > { %v549_v39 = vmul.f32 %v1379_v28, %v547_v5  ;;  %v550_v3 = vmul.f32 %v1384_v56, %v547_v5  ;;  %v540_v63 = vmul.f32 %v1379_v28, %v538_v25  ;;  %v541_v44 = vmul.f32 %v1384_v56, %v538_v25 }
  0xb6   : > { %v551_v11 = vadd.f32 %v549_v39, %v523_v59  ;;  %v552_v40 = vadd.f32 %v550_v3, %v524_v62  ;;  %v542_v0 = vadd.f32 %v540_v63, %v514_v61  ;;  %v543_v1 = vadd.f32 %v541_v44, %v515_v24 }
  0xb7   : > { %v659_v4 = vpop.permute.xlu1 %658  ;;  %v635_v6 = vpop.permute.xlu0 %634 }
  0xb8   : > { %v581_v45 = vrot.slane %v551_v11, 4  ;;  %v587_v13 = vrot.slane %v552_v40, 4  ;;  %v567_v46 = vrot.slane %v542_v0, 4  ;;  %v573_v18 = vrot.slane %v543_v1, 4  ;;  %v940_v53 = vpop.eup %939 }
  0xb9   : > { %v663_v20 = vrot.slane %v659_v4, %v1258_v12  ;;  %v639_v23 = vrot.slane %v635_v6, %v1258_v12 }
  0xba   : > { %v582_v28 = vadd.f32 %v581_v45, %v551_v11  ;;  %v588_v51 = vadd.f32 %v587_v13, %v552_v40  ;;  %v568_v56 = vadd.f32 %v567_v46, %v542_v0  ;;  %v574_v30 = vadd.f32 %v573_v18, %v543_v1 }
  0xbb   : > { %v665_v32 = vmul.f32 %v1414_v19, %v663_v20  ;;  %v641_v37 = vmul.f32 %v1414_v19, %v639_v23 }
  0xbc   : > { %v583_v31 = vrot.slane %v582_v28, 2  ;;  %v589_v52 = vrot.slane %v588_v51, 2  ;;  %v569_v35 = vrot.slane %v568_v56, 2  ;;  %v575_v14 = vrot.slane %v574_v30, 2 }
  0xbd   : > { %v671_v41 = vrot.slane %v665_v32, %v1258_v12  ;;  %v675_v29 = vrot.slane %v665_v32, %v1264_v17  ;;  %v647_v10 = vrot.slane %v641_v37, %v1258_v12  ;;  %v651_v22 = vrot.slane %v641_v37, %v1264_v17  ;;  %v942_v16 = vpop.eup %941 }
  0xbe   : > { %v584_v36 = vadd.f32 %v583_v31, %v582_v28  ;;  %v590_v38 = vadd.f32 %v589_v52, %v588_v51  ;;  %v570_v57 = vadd.f32 %v569_v35, %v568_v56  ;;  %v576_v26 = vadd.f32 %v575_v14, %v574_v30 }
  0xc0   : > { %v585_v42 = vrot.slane %v584_v36, 1  ;;  %v591_v58 = vrot.slane %v590_v38, 1  ;;  %v571_v8 = vrot.slane %v570_v57, 1  ;;  %v577_v7 = vrot.slane %v576_v26, 1 }
  0xc2   : > { %v586_v19 = vadd.f32 %v585_v42, %v584_v36  ;;  %v592_v15 = vadd.f32 %v591_v58, %v590_v38  ;;  %v572_v27 = vadd.f32 %v571_v8, %v570_v57  ;;  %v578_v55 = vadd.f32 %v577_v7, %v576_v26 }
  0xc4   : > { %v678_v47 = vadd.f32 %v671_v41, %v586_v19  ;;  %v679_v43 = vadd.f32 %v675_v29, %v592_v15  ;;  %v654_v9 = vadd.f32 %v647_v10, %v572_v27  ;;  %v655_v21 = vadd.f32 %v651_v22, %v578_v55 }
  0xc6   : > { %v707_v50 = vmul.f32 %v940_v53, %v678_v47  ;;  %v708_v54 = vmul.f32 %v942_v16, %v679_v43  ;;  %v682_v33 = vmul.f32 %v940_v53, %v654_v9  ;;  %v683_v34 = vmul.f32 %v942_v16, %v655_v21 }
  0xc8   : > { %v711_v12 = vcombine.low %v707_v50, %v708_v54  ;;  %v686_v60 = vcombine.low %v682_v33, %v683_v34 }
  0xca   : > { %v693_v17 = vrot.slane %v686_v60, %v1375_v48  ;;  %v718_v59 = vrot.slane %v711_v12, %v1375_v48 }
  0xcc   : > { %v700_v62 = vrot.slane %v693_v17, %v1375_v48  ;;  %v725_v61 = vrot.slane %v718_v59, %v1375_v48 }
  0xce   : > { %706 = vst.msk [vmem:[%s188_s28] ss:$2 sm:$0x3] %vm704_vm0, %v700_v62  ;;  %830 = vst.msk [vmem:[%s188_s28 + $0x1] ss:$2 sm:$0x3] %vm704_vm0, %v725_v61 }
  0xcf   : > { %956 = shalt.err (!%p953_p5)
}
  0xd0   : > { %s957_s10 = scalar_lea.hbm %s1456_s5, 64  ;;  %s961_s21 = scalar_lea.hbm %s1508_s3, 128 }
  0xd1   : > { %p958_p6 = scmp.ne.s32.totalorder %s1456_s5, %s957_s10  ;;  %p962_p10 = scmp.lt.u32.totalorder %s1456_s5, %s1508_s3 }
  0xd2   : > { %p963_p11 = scmp.lt.u32.totalorder %s961_s21, %s957_s10  ;;  %p965_p13 = scmp.lt.u32.totalorder %s957_s10, %s1456_s5 }
  0xd3   : > { %p959_p7 = pnand %p958_p6, %p1086_p4 }
  0xd4   : > { %p964_p12 = por %p963_p11, %p962_p10 }
  0xd5   : > { %p960_p9 = pneg %p959_p7 }
  0xd6   : > { %p966_p0 = por %p965_p13, %p964_p12 }
  0xd8   : > { %p967_p1 = pnand %p966_p0, %p960_p9 }
  0xda   : > { %970 = shalt.err (!%p967_p1)
}
  0xdb   : > { %838 = dma.vmem_to_hbm [thread:$0]  (%p1086_p4), %s1458_s29, 64, %s1456_s5, %s730_s15  }
  0xdc PF: > { %p844_p2 = scmp.ge.s32.totalorder %s1021_s17, 2  ;;  %s758_s26 = sand.u32 1, %s1001_s12  }
  0xdd   : > { %s759_s27 = scalar_lea.sflag [#allocation3], %s758_s26 }
  0xde   : > { %p841_p3 = pnand %p844_p2, %p1093_p8 }
  0xe0   : > { %996 = dma.done.wait (!%p841_p3), %s759_s27, 64  }
  0xe1   : > { %998 = vsyncadd (!%p841_p3), %s759_s27, 4294967232  ;;  %s16_s17 = sadd.s32 1, %s1021_s17   ;;  %s1511_s12 = smov %s1005_s13 }
  0xe2   : > { %p13_p5 = scmp.ge.s32.totalorder %s16_s17, 4   ;;  %s1512_s13 = smov %s1009_s14 }
  0xe3   : > { %s1513_s14 = smov %s1099_s25  ;;  %s1514_s15 = smov %s1017_s16 }
  0xe4   : > { %s1515_s16 = smov %s1517_s20  ;;  %15 = sbr.rel (!%p13_p5) target bundleno = 4 (0x4), region = 69 }
  0xeb   :  { %764 = vsyncpa [#allocation3], 1 }
  0xec   :  { %766 = vsyncpa [#allocation3 + $0x1], 1 }

</bundles_post_ra>
